<compile_context>
chip_gen: v5e
topology: v5e:2x2
jax: 0.10.0
libtpu: 0.0.40
codegen_flags: <defaults>
</compile_context>

<pallas_src>
import numpy as np
import jax
import jax.numpy as jnp
from jax.experimental import pallas as pl
from jax.experimental.pallas import tpu as pltpu


def _round_up(x, m):
    return ((x + m - 1) // m) * m


def _cdiv(a, b):
    return -(-a // b)


_SMALL_WEIGHT_BYTES = 6 * 1024 * 1024   # resident-weight fast-path threshold
_VMEM_TILE_BUDGET = 40 * 1024 * 1024    # working-set target (fits v7x 64 MiB)


# ----------------------------------------------------------------------------
# Kernels
# ----------------------------------------------------------------------------
def _bh_single_k_kernel(x_ref, w_ref, b_ref, s_ref, o_ref):
    # Whole K in one tile: plain MXU matmul, scale+bias epilogue, no scratch.
    acc = jnp.dot(x_ref[...], w_ref[...], preferred_element_type=jnp.float32)
    o_ref[...] = (acc * s_ref[0, 0] + b_ref[...]).astype(o_ref.dtype)


def _bh_multi_k_f32out_kernel(x_ref, w_ref, b_ref, s_ref, o_ref):
    # K-tiled accumulation directly into the (resident) f32 output block.
    k = pl.program_id(2)

    @pl.when(k == 0)
    def _():
        o_ref[...] = jnp.zeros_like(o_ref)

    o_ref[...] += jnp.dot(x_ref[...], w_ref[...],
                          preferred_element_type=jnp.float32)

    @pl.when(k == pl.num_programs(2) - 1)
    def _():
        o_ref[...] = o_ref[...] * s_ref[0, 0] + b_ref[...]


def _bh_multi_k_scratch_kernel(x_ref, w_ref, b_ref, s_ref, o_ref, acc_ref):
    # K-tiled accumulation in an f32 scratch (used for non-f32 output dtypes).
    k = pl.program_id(2)

    @pl.when(k == 0)
    def _():
        acc_ref[...] = jnp.zeros_like(acc_ref)

    acc_ref[...] += jnp.dot(x_ref[...], w_ref[...],
                            preferred_element_type=jnp.float32)

    @pl.when(k == pl.num_programs(2) - 1)
    def _():
        o_ref[...] = (acc_ref[...] * s_ref[0, 0] + b_ref[...]).astype(o_ref.dtype)


# ----------------------------------------------------------------------------
# One-time (weight load / update) preparation -- NOT in the hot path.
# ----------------------------------------------------------------------------
def prepare_base_head_params(weight_v, weight_g, bias_v, bias_g,
                             *, compute_dtype=None, tn=None, tk=None):
    """Compute the fused weight-norm scale and normalized bias once, pick N/K
    tiles once, and repack the weight (pad, cast, transpose) once."""
    N, K = weight_v.shape
    compute_dtype = jnp.dtype(compute_dtype or weight_v.dtype)
    w_bytes = compute_dtype.itemsize

    # Hoisted norm math (f32 for accuracy).
    wv32 = weight_v.astype(jnp.float32)
    s = (jnp.asarray(weight_g, jnp.float32)
         / jnp.sqrt(jnp.sum(wv32 * wv32))).reshape(1, 1)
    bv32 = bias_v.astype(jnp.float32)
    b = (bv32 * (jnp.asarray(bias_g, jnp.float32)
                 / jnp.sqrt(jnp.sum(bv32 * bv32)))).reshape(1, N)

    # N/K tile selection (weight layout fixed here, once).
    Np128 = _round_up(N, 128)
    Kp128 = _round_up(K, 128)
    if tn is None or tk is None:
        if Np128 * Kp128 * w_bytes <= _SMALL_WEIGHT_BYTES:
            tn_d, tk_d = Np128, Kp128          # whole weight resident, no K axis
        else:
            tk_d = min(2048 if w_bytes <= 2 else 1024, Kp128)
            tn_d = min(512, Np128)
        tn = tn or tn_d
        tk = tk or tk_d
    Np = _round_up(N, tn)
    Kp = _round_up(K, tk)

    # One-time pad + cast + transpose to (Kp, Np): the kernel then does plain
    # (tm,tk)x(tk,tn) MXU matmuls -- no per-call jnp.pad, no per-tile transpose.
    w = jnp.pad(weight_v.astype(compute_dtype), ((0, Np - N), (0, Kp - K)))
    w_t = jnp.transpose(w)                              # (Kp, Np)
    b_p = jnp.pad(b, ((0, 0), (0, Np - N)))             # f32, epilogue add

    return dict(w=w_t, b=b_p, s=s, N=N, K=K, tn=tn, tk=tk,
                compute_dtype=compute_dtype)


# ----------------------------------------------------------------------------
# Hot path
# ----------------------------------------------------------------------------
def base_head_forward(x, params, *, tm=None):
    """y = x @ W.T + b using cached/prepared params. x: (..., in_features)."""
    orig_shape = x.shape
    K = orig_shape[-1]
    assert K == params["K"], "feature dimension mismatch"
    x2 = x.reshape(-1, K)
    M = x2.shape[0]
    N, tn, tk = params["N"], params["tn"], params["tk"]
    w, b, s = params["w"], params["b"], params["s"]
    Kp, Np = w.shape
    cdt = params["compute_dtype"]
    out_dtype = x.dtype
    in_bytes = cdt.itemsize
    out_bytes = jnp.dtype(out_dtype).itemsize

    grid_k = Kp // tk
    use_scratch = (grid_k > 1) and (out_dtype != jnp.float32)

    # --- tm: as large as the VMEM budget allows, then v7x dual-TC friendly ---
    if tm is None:
        fixed = 2 * tk * tn * in_bytes                           # weight bufs
        per_row = 2 * tk * in_bytes + 2 * tn * out_bytes + tn * 4
        tm = int((_VMEM_TILE_BUDGET - fixed) // per_row)
        tm = max(16, min(512, (tm // 16) * 16, _round_up(M, 16)))
        if Np // tn == 1 and M > 16 and _round_up(M, tm) // tm < 2:
            # N fits one tile: split M so both v7x TensorCores get a block.
            tm = max(16, min(tm, _round_up(_cdiv(M, 2), 16)))
    Mp = _round_up(M, tm)

    # --- per-call x prep (cast / pad only when actually needed) --------------
    x_p = x2 if x2.dtype == cdt else x2.astype(cdt)
    if Mp != M or Kp != K:
        x_p = jnp.pad(x_p, ((0, Mp - M), (0, Kp - K)))

    # --- pallas_call plumbing -------------------------------------------------
    needed = ((2 * tm * tk + 2 * tk * tn) * in_bytes
              + 2 * tm * tn * out_bytes + tm * tn * 4 + 2 * tn * 4)
    vmem_limit = int(min(max(needed + (8 << 20), 32 << 20), 48 << 20))
    cost = pl.CostEstimate(
        flops=2 * M * N * K,
        transcendentals=0,
        bytes_accessed=(M * K + K * N) * in_bytes + M * N * out_bytes)
    smem_spec = pl.BlockSpec(memory_space=pltpu.MemorySpace.SMEM)

    if grid_k == 1:
        grid = (Mp // tm, Np // tn)
        kernel = _bh_single_k_kernel
        in_specs = [
            pl.BlockSpec((tm, tk), lambda i, j: (i, 0)),   # x
            pl.BlockSpec((tk, tn), lambda i, j: (0, j)),   # weight (resident)
            pl.BlockSpec((1, tn), lambda i, j: (0, j)),    # normalized bias
            smem_spec,                                     # fused scalar scale
        ]
        out_spec = pl.BlockSpec((tm, tn), lambda i, j: (i, j))
        scratch = ()
        semantics = ("parallel", "parallel")
    else:
        grid = (Mp // tm, Np // tn, grid_k)
        kernel = (_bh_multi_k_scratch_kernel if use_scratch
                  else _bh_multi_k_f32out_kernel)
        in_specs = [
            pl.BlockSpec((tm, tk), lambda i, j, k: (i, k)),   # x
            pl.BlockSpec((tk, tn), lambda i, j, k: (k, j)),   # weight (K, N)
            pl.BlockSpec((1, tn), lambda i, j, k: (0, j)),    # normalized bias
            smem_spec,                                        # scalar scale
        ]
        out_spec = pl.BlockSpec((tm, tn), lambda i, j, k: (i, j))
        scratch = (pltpu.VMEM((tm, tn), jnp.float32),) if use_scratch else ()
        semantics = ("parallel", "parallel", "arbitrary")

    out = pl.pallas_call(
        kernel,
        out_shape=jax.ShapeDtypeStruct((Mp, Np), out_dtype),
        grid_spec=pltpu.PrefetchScalarGridSpec(
            num_scalar_prefetch=0,
            grid=grid,
            in_specs=in_specs,
            out_specs=out_spec,
            scratch_shapes=scratch,
        ),
        compiler_params=pltpu.CompilerParams(
            dimension_semantics=semantics,
            vmem_limit_bytes=vmem_limit,
        ),
        cost_estimate=cost,
    )(x_p, w, b, s)

    y = out[:M, :N]
    return y.reshape(orig_shape[:-1] + (N,))


# ----------------------------------------------------------------------------
# Parameter init (emulates nn.Linear default init + WeightNorm._reset) and a
# float64 numpy reference of BaseHead.forward.
# ----------------------------------------------------------------------------
def init_base_head_params(key, in_features, num_classes):
    k_w, k_b = jax.random.split(key)
    bound = 1.0 / jnp.sqrt(jnp.float32(in_features))
    weight = jax.random.uniform(
        k_w, (num_classes, in_features), jnp.float32, -bound, bound)
    bias = jax.random.uniform(
        k_b, (num_classes,), jnp.float32, -bound, bound)

    weight_g = jnp.sqrt(jnp.sum(weight * weight))        # Frobenius norm
    weight_v = weight / weight_g
    bias_g = jnp.sqrt(jnp.sum(bias * bias))
    bias_v = bias / bias_g
    return weight_v, weight_g, bias_v, bias_g


def reference_forward(x, weight_v, weight_g, bias_v, bias_g):
    """float64 numpy reference: W = v*(g/||v||_F), b = bv*(bg/||bv||), x@W.T+b."""
    x = np.asarray(jnp.asarray(x, jnp.float32), np.float64)
    v = np.asarray(weight_v, np.float64)
    bv = np.asarray(bias_v, np.float64)
    w = v * (float(weight_g) / np.linalg.norm(v))
    b = bv * (float(bias_g) / np.linalg.norm(bv))
    return x @ w.T + b


def _to_np(a):
    return np.asarray(jnp.asarray(a, jnp.float32), np.float64)


if __name__ == "__main__":
    key = jax.random.PRNGKey(0)
    k_param, k_x = jax.random.split(key)

    # --- 1) small head, f32: single resident weight block (no K grid axis) ---
    B, in_features, num_classes = 8, 32, 16
    wv, wg, bv, bg = init_base_head_params(k_param, in_features, num_classes)
    x = jax.random.normal(k_x, (B, in_features), jnp.float32)
    ref = reference_forward(x, wv, wg, bv, bg)

    params = prepare_base_head_params(wv, wg, bv, bg)
    out = jax.block_until_ready(base_head_forward(x, params))
    assert out.shape == (B, num_classes)
    assert np.allclose(_to_np(out), ref, atol=2e-3, rtol=2e-3), "f32 fast path mismatch"

    # --- 2) forced multi-K grid, f32 output -> direct accumulation into o_ref --
    M2, K2, N2 = 16, 256, 16
    wv2, wg2, bv2, bg2 = init_base_head_params(k_param, K2, N2)
    x2 = jax.random.normal(k_x, (M2, K2), jnp.float32)
    ref2 = reference_forward(x2, wv2, wg2, bv2, bg2)
    params2 = prepare_base_head_params(wv2, wg2, bv2, bg2, tn=128, tk=128)
    out2 = jax.block_until_ready(base_head_forward(x2, params2, tm=8))
    assert np.allclose(_to_np(out2), ref2, atol=2e-3, rtol=2e-3), "multi-K f32 mismatch"

    # --- 3) bf16 compute dtype (f32 accumulation), small-head fast path -------
    params_bf = prepare_base_head_params(wv, wg, bv, bg,
                                         compute_dtype=jnp.bfloat16)
    out_bf = jax.block_until_ready(base_head_forward(x, params_bf))
    assert np.allclose(_to_np(out_bf), ref, atol=6e-2, rtol=6e-2), "bf16 compute mismatch"

    # --- 4) bf16 output + multi-K -> scratch-accumulator kernel ---------------
    x4 = x2.astype(jnp.bfloat16)
    ref4 = reference_forward(x4, wv2, wg2, bv2, bg2)
    out4 = jax.block_until_ready(base_head_forward(x4, params2, tm=8))
    assert out4.dtype == jnp.bfloat16
    assert np.allclose(_to_np(out4), ref4, atol=6e-2, rtol=6e-2), "bf16 out mismatch"

    print("KERNEL_OK")
</pallas_src>

<mosaic_0001>
module attributes {stable_mosaic.version = 11 : i64} {
  func.func @_bh_single_k_kernel(%arg0: i32, %arg1: i32, %arg2: memref<16x128xf32, #tpu.memory_space<vmem>>, %arg3: memref<128x128xf32, #tpu.memory_space<vmem>>, %arg4: memref<1x128xf32, #tpu.memory_space<vmem>>, %arg5: memref<1x1xf32, #tpu.memory_space<smem>>, %arg6: memref<16x128xf32, #tpu.memory_space<vmem>>) attributes {dimension_semantics = [#tpu.dimension_semantics<parallel>, #tpu.dimension_semantics<parallel>], iteration_bounds = array<i64: 1, 1>, scalar_prefetch = 0 : i64, scratch_operands = 0 : i64, tpu.core_type = #tpu.core_type<tc>, window_params = [{transform_indices = @transform_0, window_bounds = array<i64: 16, 128>}, {transform_indices = @transform_1, window_bounds = array<i64: 128, 128>}, {transform_indices = @transform_2, window_bounds = array<i64: 1, 128>}, {transform_indices = @transform_3, window_bounds = array<i64: 1, 1>}, {transform_indices = @transform_4, window_bounds = array<i64: 16, 128>}]} {
    %c0 = arith.constant 0 : index
    %c0_0 = arith.constant 0 : index
    %0 = vector.load %arg2[%c0, %c0_0] : memref<16x128xf32, #tpu.memory_space<vmem>>, vector<16x128xf32>
    %c0_1 = arith.constant 0 : index
    %c0_2 = arith.constant 0 : index
    %1 = vector.load %arg3[%c0_1, %c0_2] : memref<128x128xf32, #tpu.memory_space<vmem>>, vector<128x128xf32>
    %cst = arith.constant dense<0.000000e+00> : vector<16x128xf32>
    %2 = tpu.matmul %0, %1, %cst {dimension_numbers = #tpu.dot_dimension_numbers<[1], [0], [0], [1], [0, 0, 1, 1], [], []>} : vector<16x128xf32>, vector<128x128xf32>, vector<16x128xf32> -> vector<16x128xf32>
    %c0_3 = arith.constant 0 : index
    %c0_4 = arith.constant 0 : index
    %3 = memref.load %arg5[%c0_3, %c0_4] : memref<1x1xf32, #tpu.memory_space<smem>>
    %4 = vector.broadcast %3 : f32 to vector<16x128xf32>
    %5 = arith.mulf %2, %4 : vector<16x128xf32>
    %c0_5 = arith.constant 0 : index
    %c0_6 = arith.constant 0 : index
    %6 = vector.load %arg4[%c0_5, %c0_6] : memref<1x128xf32, #tpu.memory_space<vmem>>, vector<1x128xf32>
    %7 = vector.broadcast %6 : vector<1x128xf32> to vector<16x128xf32>
    %8 = arith.addf %5, %7 : vector<16x128xf32>
    %c0_7 = arith.constant 0 : index
    %c0_8 = arith.constant 0 : index
    %9 = vector.load %arg6[%c0_7, %c0_8] : memref<16x128xf32, #tpu.memory_space<vmem>>, vector<16x128xf32>
    tpu.vector_store %arg6[%c0_7, %c0_8], %8 {strides = array<i32>} : memref<16x128xf32, #tpu.memory_space<vmem>>, vector<16x128xf32>,
    return
  }
  func.func @transform_0(%arg0: i32, %arg1: i32) -> (i32, i32) {
    %c0_i32 = arith.constant 0 : i32
    %c0_i32_0 = arith.constant 0 : i32
    return %arg0, %c0_i32 : i32, i32
  }
  func.func @transform_1(%arg0: i32, %arg1: i32) -> (i32, i32) {
    %c0_i32 = arith.constant 0 : i32
    %c0_i32_0 = arith.constant 0 : i32
    return %c0_i32, %arg1 : i32, i32
  }
  func.func @transform_2(%arg0: i32, %arg1: i32) -> (i32, i32) {
    %c0_i32 = arith.constant 0 : i32
    %c0_i32_0 = arith.constant 0 : i32
    return %c0_i32, %arg1 : i32, i32
  }
  func.func @transform_3(%arg0: i32, %arg1: i32) -> (i32, i32) {
    %c0_i32 = arith.constant 0 : i32
    %c0_i32_0 = arith.constant 0 : i32
    %c0_i32_1 = arith.constant 0 : i32
    return %c0_i32, %c0_i32_0 : i32, i32
  }
  func.func @transform_4(%arg0: i32, %arg1: i32) -> (i32, i32) {
    %c0_i32 = arith.constant 0 : i32
    return %arg0, %arg1 : i32, i32
  }
}

</mosaic_0001>

<bundles_post_ra>
// kernel: tpu_custom_call.1
= control target key start
LH: loop header
LB: loop body
LE: loop exit
PB: predicated region body
PF: predicated region fallthrough
CT: control target
= control target key end

     0   :  { %10 = vsyncpa [#allocation4], 0  ;;  %s278_s0 = inlined_call_operand.hbm [shape: f32[16,128], index: 0, kind: input, shape index: {}]   ;;  %s279_s1 = inlined_call_operand.hbm [shape: f32[128,128], index: 1, kind: input, shape index: {}]   ;;  %s280_s2 = inlined_call_operand.vmem [shape: f32[1,128], index: 2, kind: input, shape index: {}]   ;;  %s281_s3 = inlined_call_operand.<no memory space> [shape: f32[1,1], index: 3, kind: input, shape index: {}]   ;;  %s282_s4 = inlined_call_operand.hbm [shape: f32[16,128], index: 4, kind: output, shape index: {}]  }
   0x1   :  { %11 = vsyncpa [#allocation7], 0 }
   0x2   :  { %12 = vsyncpa [#allocation5], 0  ;;  %s17_s17 = sshll.u32 %s278_s0, 4  ;;  %s224_s18 = smov [#allocation3]   ;;  %s18_s17 = int_to_ptr.hbm [resolvable:$true] %s17_s17 }
   0x3   :  { %s19_s19 = sshll.u32 %s224_s18, 4  ;;  %s30_s22 = sshll.u32 %s279_s1, 4  ;;  %s20_s19 = int_to_ptr.vmem [resolvable:$true] %s19_s19  ;;  %s31_s22 = int_to_ptr.hbm [resolvable:$true] %s30_s22 }
   0x4   :  { %s225_s23 = smov 128   ;;  %s226_s24 = smov 8  }
   0x5   :  { %25 = dma.hbm_to_vmem [thread:$0]  %s18_s17, 256, %s20_s19, [#allocation4], %s225_s23, %s225_s23, %s226_s24  }
   0x6   :  { %s227_s25 = smov [#allocation6]  }
   0x7   :  { %s32_s26 = sshll.u32 %s227_s25, 4  ;;  %s33_s26 = int_to_ptr.vmem [resolvable:$true] %s32_s26 }
   0x8   :  { %38 = dma.hbm_to_vmem [thread:$0]  %s31_s22, 2048, %s33_s26, [#allocation7], %s225_s23, %s225_s23, %s226_s24  }
   0x9   :  { %218 = dma.done.wait [#allocation4], 256  }
   0xa   :  { %219 = vsyncadd [#allocation4], 4294967040 }
   0xb   :  { %220 = dma.done.wait [#allocation7], 2048  }
   0xc   :  { %221 = vsyncadd [#allocation7], 4294965248  ;;  %v68_v0 = vld [vmem:[#allocation6 + $0x78] sm:$0xff]  ;;  %v67_v1 = vld [vmem:[#allocation6 + $0x70] sm:$0xff]  ;;  %v93_v18 = vstv %s281_s3  ;;  %s228_s29 = smov [#allocation8]   ;;  %s110_s7 = sshll.u32 %s282_s4, 4  ;;  %s111_s7 = int_to_ptr.hbm [resolvable:$true] %s110_s7 }
   0xd   :  { %69 = vmatpush.msra.mxu0 %v68_v0  ;;  %124 = vmatpush.msra.mxu1 %v68_v0  ;;  %v66_v2 = vld [vmem:[#allocation6 + $0x68] sm:$0xff]  ;;  %v65_v3 = vld [vmem:[#allocation6 + $0x60] sm:$0xff]  ;;  %v64_v4 = vld [vmem:[#allocation6 + $0x58] sm:$0xff]  ;;  %s108_s30 = sshll.u32 %s228_s29, 4  ;;  %s109_s30 = int_to_ptr.vmem [resolvable:$true] %s108_s30 }
   0xe   :  { %v63_v5 = vld [vmem:[#allocation6 + $0x50] sm:$0xff]  ;;  %v62_v6 = vld [vmem:[#allocation6 + $0x48] sm:$0xff]  ;;  %v61_v7 = vld [vmem:[#allocation6 + $0x40] sm:$0xff] }
   0xf   :  { %70 = vmatpush.msra.mxu0 %v67_v1  ;;  %125 = vmatpush.msra.mxu1 %v67_v1  ;;  %v60_v8 = vld [vmem:[#allocation6 + $0x38] sm:$0xff]  ;;  %v59_v9 = vld [vmem:[#allocation6 + $0x30] sm:$0xff]  ;;  %v58_v10 = vld [vmem:[#allocation6 + $0x28] sm:$0xff] }
  0x10   :  { %v57_v11 = vld [vmem:[#allocation6 + $0x20] sm:$0xff]  ;;  %v56_v12 = vld [vmem:[#allocation6 + $0x18] sm:$0xff]  ;;  %v55_v13 = vld [vmem:[#allocation6 + $0x10] sm:$0xff] }
  0x11   :  { %71 = vmatpush.msra.mxu0 %v66_v2  ;;  %126 = vmatpush.msra.mxu1 %v66_v2  ;;  %v54_v14 = vld [vmem:[#allocation6 + $0x8] sm:$0xff]  ;;  %v53_v15 = vld [vmem:[#allocation6] sm:$0xff]  ;;  %v51_v16 = vld [vmem:[#allocation3] sm:$0xff] }
  0x12   :  { %v52_v17 = vld [vmem:[#allocation3 + $0x8] sm:$0xff]  ;;  %v145_v19 = vld [vmem:[%s280_s2] ss:$0 sm:$0xff] }
  0x13   :  { %72 = vmatpush.msra.mxu0 %v65_v3  ;;  %127 = vmatpush.msra.mxu1 %v65_v3 }
  0x15   :  { %73 = vmatpush.msra.mxu0 %v64_v4  ;;  %128 = vmatpush.msra.mxu1 %v64_v4 }
  0x17   :  { %74 = vmatpush.msra.mxu0 %v63_v5  ;;  %129 = vmatpush.msra.mxu1 %v63_v5 }
  0x19   :  { %75 = vmatpush.msra.mxu0 %v62_v6  ;;  %130 = vmatpush.msra.mxu1 %v62_v6 }
  0x1b   :  { %76 = vmatpush.msra.mxu0 %v61_v7  ;;  %131 = vmatpush.msra.mxu1 %v61_v7 }
  0x1d   :  { %77 = vmatpush.msra.mxu0 %v60_v8  ;;  %132 = vmatpush.msra.mxu1 %v60_v8 }
  0x1f   :  { %78 = vmatpush.msra.mxu0 %v59_v9  ;;  %133 = vmatpush.msra.mxu1 %v59_v9 }
  0x21   :  { %79 = vmatpush.msra.mxu0 %v58_v10  ;;  %134 = vmatpush.msra.mxu1 %v58_v10 }
  0x23   :  { %80 = vmatpush.msra.mxu0 %v57_v11  ;;  %135 = vmatpush.msra.mxu1 %v57_v11 }
  0x25   :  { %81 = vmatpush.msra.mxu0 %v56_v12  ;;  %136 = vmatpush.msra.mxu1 %v56_v12 }
  0x27   :  { %82 = vmatpush.msra.mxu0 %v55_v13  ;;  %137 = vmatpush.msra.mxu1 %v55_v13 }
  0x29   :  { %83 = vmatpush.msra.mxu0 %v54_v14  ;;  %138 = vmatpush.msra.mxu1 %v54_v14 }
  0x2b   :  { %84 = vmatpush.msra.mxu0 %v53_v15  ;;  %139 = vmatpush.msra.mxu1 %v53_v15 }
  0x2c   :  { %85 = vmatmul.f32.vlgmr.msra.gmra.mxu0 %v51_v16  ;;  %88 = vmatmul.f32.vlgmr.msra.gmra.mxu1 %v52_v17 }
  0xa9   :  { %v86_v20 = vpop.f32.mrf.mxu0  ;;  %v89_v21 = vpop.f32.mrf.mxu1 }
  0xaa   :  { %v94_v22 = vmul.f32 %v93_v18, %v86_v20  ;;  %v95_v23 = vmul.f32 %v93_v18, %v89_v21 }
  0xac   :  { %v100_v24 = vadd.f32 %v145_v19, %v94_v22  ;;  %v101_v25 = vadd.f32 %v145_v19, %v95_v23 }
  0xae   :  { %102 = vst [vmem:[#allocation8] sm:$0xff] %v100_v24 }
  0xaf   :  { %103 = vst [vmem:[#allocation8 + $0x8] sm:$0xff] %v101_v25 }
  0xb0   :  { %116 = dma.vmem_to_hbm [thread:$0]  %s109_s30, 256, %s111_s7, [#allocation5], %s225_s23, %s225_s23, %s226_s24  }
  0xb1   :  { %222 = dma.done.wait [#allocation5], 256  }
  0xb2   :  { %223 = vsyncadd [#allocation5], 4294967040 }
  0xb3   :  { %121 = vsyncpa [#allocation4], 1 }
  0xb4   :  { %122 = vsyncpa [#allocation7], 1 }
  0xb5   :  { %123 = vsyncpa [#allocation5], 1 }

</bundles_post_ra>
